<compile_context>
chip_gen: v7x
topology: tpu7x:2x2x1
jax: 0.10.0
libtpu: 0.0.40
codegen_flags: <defaults>
</compile_context>

<pallas_src>
import jax
import jax.numpy as jnp
from jax.experimental import pallas as pl
from jax.experimental.pallas import tpu as pltpu

K = 3                      # kernel_size; padding = (K - 1) // 2 = 1; stride = 1
_LANE = 128
_VMEM_BUDGET = 48 << 20    # per-step block budget, safe for v7x's 64 MiB VMEM


def _round_up(x, m):
    return (x + m - 1) // m * m


def _vmem_need(tm, tn, kk_blk, out_itemsize, k_tiled):
    # double-buffered x (bf16) + w (bf16) + bias (f32) + out, plus f32 scratch
    need = 2 * (tm * kk_blk * 2 + kk_blk * tn * 2 + tn * 4 + tm * tn * out_itemsize)
    if k_tiled:
        need += tm * tn * 4
    return need


def _plan(M, kkc, c_out, out_itemsize, k_tile_override):
    """Returns (tm, tn, c_pad, kkc_pad, k_tile, k_tiled)."""
    c_pad = _round_up(c_out, _LANE)
    if M >= 1024:
        tm = 512
    elif M >= 512:
        tm = 256                       # keep >= 2 row tiles for dual-TC (v7x)
    else:
        tm = _round_up(M, 8)

    if k_tile_override is not None:    # forced K-tiled path (testing / tuning)
        k_tile = int(k_tile_override)
        tn = 256 if c_pad % 256 == 0 else _LANE
        return tm, tn, c_pad, _round_up(kkc, k_tile), k_tile, True

    kkc_pad = _round_up(kkc, _LANE) if kkc >= _LANE else kkc
    # Plan A: single-shot matmul, whole (padded) Cout per tile -> weights
    # fetched exactly once (block index constant across the grid).
    if _vmem_need(tm, c_pad, kkc_pad, out_itemsize, False) <= _VMEM_BUDGET:
        return tm, c_pad, c_pad, kkc_pad, kkc_pad, False

    # Plan B: contraction-dim tiling with a VMEM accumulator (huge Cin / Cout).
    tn = 256 if c_pad % 256 == 0 else _LANE
    k_tile = 2048
    while k_tile > _LANE and _vmem_need(tm, tn, k_tile, out_itemsize, True) > _VMEM_BUDGET:
        k_tile //= 2
    return tm, tn, c_pad, _round_up(kkc, k_tile), k_tile, True


def _conv_mm_kernel(x_ref, w_ref, b_ref, o_ref):
    # x_ref: (TM, KKC)  bf16 im2col rows; w_ref: (KKC, TN) bf16 folded weights
    # b_ref: (1, TN) f32; o_ref: (TM, TN) consumer dtype, lane-dense
    acc = jnp.dot(x_ref[...], w_ref[...], preferred_element_type=jnp.float32)
    o_ref[...] = jnp.maximum(acc + b_ref[...], 0.0).astype(o_ref.dtype)


def _conv_mm_kernel_ktiled(x_ref, w_ref, b_ref, o_ref, acc_ref):
    k = pl.program_id(2)

    @pl.when(k == 0)
    def _():
        acc_ref[...] = jnp.zeros_like(acc_ref)

    acc_ref[...] += jnp.dot(x_ref[...], w_ref[...],
                            preferred_element_type=jnp.float32)

    @pl.when(k == pl.num_programs(2) - 1)
    def _():
        o_ref[...] = jnp.maximum(acc_ref[...] + b_ref[...], 0.0).astype(o_ref.dtype)


def conv_relu_pallas(x_nchw, weight, bias, *, k_tile=None):
    """Conv2d(k=3, s=1, pad=1, bias=True) + ReLU.
    x_nchw: (N, Cin, H, W); weight: (Cout, Cin, K, K); bias: (Cout,)."""
    N, Cin, H, W = x_nchw.shape
    Cout = weight.shape[0]
    assert Cin == weight.shape[1], f"{Cin} {weight.shape[1]}"

    out_dtype = x_nchw.dtype
    out_isz = jnp.dtype(out_dtype).itemsize
    M = N * H * W
    kkc = K * K * Cin
    tm, tn, c_pad, kkc_pad, kt, k_tiled = _plan(M, kkc, Cout, out_isz, k_tile)
    m_pad = _round_up(M, tm)

    # ---- wrapper glue: NCHW -> NHWC, halo pad, im2col rows (tap-major) ----
    # TODO(synk): keep activations NHWC end-to-end in the model so these
    # transposes fuse away; for Cin >= ~128 move the 9-tap gather into the
    # kernel as an extra 'arbitrary' reduction axis to avoid materializing the
    # 9x im2col tensor in HBM.
    x_nhwc = jnp.transpose(x_nchw, (0, 2, 3, 1))                    # (N,H,W,Cin)
    x_halo = jnp.pad(x_nhwc, ((0, 0), (1, 1), (1, 1), (0, 0)))      # (N,H+2,W+2,Cin)
    taps = [x_halo[:, kh:kh + H, kw:kw + W, :]
            for kh in range(K) for kw in range(K)]
    x_cols = jnp.concatenate(taps, axis=-1).reshape(M, kkc)
    x_cols = jnp.pad(x_cols, ((0, m_pad - M), (0, kkc_pad - kkc))).astype(jnp.bfloat16)

    # folded weights, tap-major ((kh*K+kw)*Cin + ci, co), zero-padded (exact)
    w_mat = jnp.transpose(weight, (2, 3, 1, 0)).reshape(kkc, Cout)
    w_mat = jnp.pad(w_mat, ((0, kkc_pad - kkc), (0, c_pad - Cout))).astype(jnp.bfloat16)
    b_mat = jnp.pad(bias.astype(jnp.float32), (0, c_pad - Cout)).reshape(1, c_pad)

    m_tiles, c_tiles, k_tiles = m_pad // tm, c_pad // tn, kkc_pad // kt

    cost = pl.CostEstimate(
        flops=2 * M * kkc * Cout,
        transcendentals=0,
        bytes_accessed=(x_cols.size * 2 + w_mat.size * 2 + b_mat.size * 4
                        + m_pad * c_pad * out_isz))
    vmem_limit = int(min(max(_vmem_need(tm, tn, kt, out_isz, k_tiled) + (4 << 20),
                             32 << 20), 52 << 20))

    if not k_tiled:
        grid_spec = pltpu.PrefetchScalarGridSpec(
            num_scalar_prefetch=0,
            grid=(m_tiles, c_tiles),
            in_specs=[
                pl.BlockSpec((tm, kkc_pad), lambda i, j: (i, 0)),
                pl.BlockSpec((kkc_pad, tn), lambda i, j: (0, j)),  # constant when tn==c_pad
                pl.BlockSpec((1, tn), lambda i, j: (0, j)),
            ],
            out_specs=pl.BlockSpec((tm, tn), lambda i, j: (i, j)),
        )
        kernel = _conv_mm_kernel
        dim_sem = ("parallel", "parallel")
    else:
        grid_spec = pltpu.PrefetchScalarGridSpec(
            num_scalar_prefetch=0,
            grid=(m_tiles, c_tiles, k_tiles),
            in_specs=[
                pl.BlockSpec((tm, kt), lambda i, j, k: (i, k)),
                pl.BlockSpec((kt, tn), lambda i, j, k: (k, j)),
                pl.BlockSpec((1, tn), lambda i, j, k: (0, j)),
            ],
            out_specs=pl.BlockSpec((tm, tn), lambda i, j, k: (i, j)),
            scratch_shapes=[pltpu.VMEM((tm, tn), jnp.float32)],
        )
        kernel = _conv_mm_kernel_ktiled
        dim_sem = ("parallel", "parallel", "arbitrary")

    out = pl.pallas_call(
        kernel,
        out_shape=jax.ShapeDtypeStruct((m_pad, c_pad), out_dtype),
        grid_spec=grid_spec,
        compiler_params=pltpu.CompilerParams(
            dimension_semantics=dim_sem,
            vmem_limit_bytes=vmem_limit,
        ),
        cost_estimate=cost,
    )(x_cols, w_mat, b_mat)

    out = out[:M, :Cout].reshape(N, H, W, Cout)
    return jnp.transpose(out, (0, 3, 1, 2))                         # back to NCHW


def conv_relu_reference(x_nchw, weight, bias):
    """Pure-JAX reference (== nn.Conv2d(pad=1) + ReLU) for verification."""
    y = jax.lax.conv_general_dilated(
        x_nchw, weight,
        window_strides=(1, 1),
        padding=((1, 1), (1, 1)),
        dimension_numbers=("NCHW", "OIHW", "NCHW"),
    )
    y = y + bias.reshape(1, -1, 1, 1)
    return jnp.maximum(y, 0.0)


if __name__ == "__main__":
    key = jax.random.PRNGKey(0)
    kx, kw, kb, kx2, kw2, kb2 = jax.random.split(key, 6)

    conv_relu = jax.jit(conv_relu_pallas, static_argnames=("k_tile",))

    # ---- main check: small module-sized input (weight-resident fast path) ----
    N, Cin, H, W, Cout = 2, 4, 16, 16, 8
    fan_in = Cin * K * K
    x = jax.random.normal(kx, (N, Cin, H, W), dtype=jnp.float32)
    weight = jax.random.normal(kw, (Cout, Cin, K, K), dtype=jnp.float32) / jnp.sqrt(fan_in)
    bias = jax.random.normal(kb, (Cout,), dtype=jnp.float32) * 0.1

    out = jax.block_until_ready(conv_relu(x, weight, bias))
    ref = conv_relu_reference(x, weight, bias)
    assert out.shape == (N, Cout, H, W)
    # bf16 MXU operands (f32 accumulation) -> loosened tolerance vs f32 reference
    assert jnp.allclose(out, ref, atol=5e-2, rtol=5e-2), "mismatch (single-shot path)"

    # ---- second check: force the K-tiled accumulator path (large-Cin / v7x fallback) ----
    N2, Cin2, H2, W2, Cout2 = 1, 32, 8, 8, 16
    x2 = jax.random.normal(kx2, (N2, Cin2, H2, W2), dtype=jnp.float32)
    w2 = jax.random.normal(kw2, (Cout2, Cin2, K, K), dtype=jnp.float32) / jnp.sqrt(Cin2 * K * K)
    b2 = jax.random.normal(kb2, (Cout2,), dtype=jnp.float32) * 0.1

    out2 = jax.block_until_ready(conv_relu(x2, w2, b2, k_tile=128))
    ref2 = conv_relu_reference(x2, w2, b2)
    assert out2.shape == (N2, Cout2, H2, W2)
    assert jnp.allclose(out2, ref2, atol=5e-2, rtol=5e-2), "mismatch (k-tiled path)"

    print("KERNEL_OK")
</pallas_src>

<mosaic_0001>
module attributes {stable_mosaic.version = 11 : i64} {
  func.func @_conv_mm_kernel(%arg0: i32, %arg1: i32, %arg2: memref<256x36xbf16, #tpu.memory_space<vmem>>, %arg3: memref<36x128xbf16, #tpu.memory_space<vmem>>, %arg4: memref<1x128xf32, #tpu.memory_space<vmem>>, %arg5: memref<256x128xf32, #tpu.memory_space<vmem>>) attributes {dimension_semantics = [#tpu.dimension_semantics<parallel>, #tpu.dimension_semantics<parallel>], iteration_bounds = array<i64: 2, 1>, scalar_prefetch = 0 : i64, scratch_operands = 0 : i64, tpu.core_type = #tpu.core_type<tc>, window_params = [{transform_indices = @transform_0, window_bounds = array<i64: 256, 36>}, {transform_indices = @transform_1, window_bounds = array<i64: 36, 128>}, {transform_indices = @transform_2, window_bounds = array<i64: 1, 128>}, {transform_indices = @transform_3, window_bounds = array<i64: 256, 128>}]} {
    %c0 = arith.constant 0 : index
    %c0_0 = arith.constant 0 : index
    %0 = vector.load %arg2[%c0, %c0_0] : memref<256x36xbf16, #tpu.memory_space<vmem>>, vector<256x36xbf16>
    %c0_1 = arith.constant 0 : index
    %c0_2 = arith.constant 0 : index
    %1 = vector.load %arg3[%c0_1, %c0_2] : memref<36x128xbf16, #tpu.memory_space<vmem>>, vector<36x128xbf16>
    %cst = arith.constant dense<0.000000e+00> : vector<256x128xf32>
    %2 = tpu.matmul %0, %1, %cst {dimension_numbers = #tpu.dot_dimension_numbers<[1], [0], [0], [1], [0, 0, 1, 1], [], []>} : vector<256x36xbf16>, vector<36x128xbf16>, vector<256x128xf32> -> vector<256x128xf32>
    %c0_3 = arith.constant 0 : index
    %c0_4 = arith.constant 0 : index
    %3 = vector.load %arg4[%c0_3, %c0_4] : memref<1x128xf32, #tpu.memory_space<vmem>>, vector<1x128xf32>
    %4 = vector.broadcast %3 : vector<1x128xf32> to vector<256x128xf32>
    %5 = arith.addf %2, %4 : vector<256x128xf32>
    %cst_5 = arith.constant 0.000000e+00 : f32
    %6 = vector.broadcast %cst_5 : f32 to vector<256x128xf32>
    %7 = arith.maximumf %5, %6 : vector<256x128xf32>
    %c0_6 = arith.constant 0 : index
    %c0_7 = arith.constant 0 : index
    %8 = vector.load %arg5[%c0_6, %c0_7] : memref<256x128xf32, #tpu.memory_space<vmem>>, vector<256x128xf32>
    tpu.vector_store %arg5[%c0_6, %c0_7], %7 {strides = array<i32>} : memref<256x128xf32, #tpu.memory_space<vmem>>, vector<256x128xf32>,
    return
  }
  func.func @transform_0(%arg0: i32, %arg1: i32) -> (i32, i32) {
    %c0_i32 = arith.constant 0 : i32
    %c0_i32_0 = arith.constant 0 : i32
    return %arg0, %c0_i32 : i32, i32
  }
  func.func @transform_1(%arg0: i32, %arg1: i32) -> (i32, i32) {
    %c0_i32 = arith.constant 0 : i32
    %c0_i32_0 = arith.constant 0 : i32
    return %c0_i32, %arg1 : i32, i32
  }
  func.func @transform_2(%arg0: i32, %arg1: i32) -> (i32, i32) {
    %c0_i32 = arith.constant 0 : i32
    %c0_i32_0 = arith.constant 0 : i32
    return %c0_i32, %arg1 : i32, i32
  }
  func.func @transform_3(%arg0: i32, %arg1: i32) -> (i32, i32) {
    %c0_i32 = arith.constant 0 : i32
    return %arg0, %arg1 : i32, i32
  }
}

</mosaic_0001>

<bundles_post_ra>
// kernel: conv_relu_pallas.1
= control target key start
LH: loop header
LB: loop body
LE: loop exit
PB: predicated region body
PF: predicated region fallthrough
CT: control target
= control target key end

     0   :  { %s946_s12 = smov 0   ;;  %s948_s13 = smov 0   ;;  %s1097_s0 = inlined_call_operand.vmem [shape: bf16[512,36], index: 0, kind: input, shape index: {}]   ;;  %s1098_s1 = inlined_call_operand.vmem [shape: bf16[36,128], index: 1, kind: input, shape index: {}]   ;;  %s1099_s2 = inlined_call_operand.vmem [shape: f32[1,128], index: 2, kind: input, shape index: {}]   ;;  %s1100_s3 = inlined_call_operand.vmem [shape: f32[512,128], index: 3, kind: output, shape index: {}]  }
   0x1   :  { %s950_s14 = smov 0  }
   0x2 LB: > { %s25_s15 = sadd.s32 1, %s920_s13  ;;  %p751_p0 = scmp.ge.s32.totalorder %s924_s14, 1  ;;  %s924_s14 = sphi %s950_s14, %s13_s14   ;;  %s920_s13 = sphi %s948_s13, %s1102_s13   ;;  %s916_s12 = sphi %s946_s12, %s1101_s12  }
   0x3   : > { %p27_p1 = scmp.ge.s32.totalorder %s25_s15, 2  ;;  %p169_p2 = scmp.lt.s32.totalorder %s924_s14, 3 }
   0x5   : > { %s1104_s15 = smov (%p27_p1, %s25_s15), 0  ;;  %p170_p3 = pnand %p751_p0, %p169_p2 }
   0x6   : > { %v883_v0 = vld [vmem:[%s1098_s1] sm:$0xff] (!%p170_p3)   ;;  %v884_v1 = vld [vmem:[%s1098_s1 + $0x8] sm:$0xff] (!%p170_p3)   ;;  %s752_s20 = sshll.u32 (!%p170_p3), %s916_s12, 5  ;;  %v885_v2 = vld [vmem:[%s1098_s1 + $0x10] ss:$0 sps:$4 sm:$0x33] (!%p170_p3)  }
   0x7   : > { %173 = sbr.rel (%p170_p3) target bundleno = 264 (0x108), region = 32  ;;  %813 = vmatprep.subr.bf16.mxu0 (!%p170_p3), %v883_v0  ;;  %851 = vmatprep.subr.bf16.mxu1 (!%p170_p3), %v883_v0  ;;  %p204_p4 = scmp.lt.s32.totalorder (!%p170_p3), %s752_s20, 63  ;;  %vm414_vm0 = vcmask (!%p170_p3), 1041408   ;;  %vm365_vm1 = vcmask (!%p170_p3), 293888   ;;  %v1016_v20 = vld [vmem:[%s1099_s2] ss:$0 sm:$0xff] (!%p170_p3) }
   0x8   : > { %814 = vmatpush3.bf16.msra.mxu0 (!%p170_p3), %v883_v0  ;;  %854 = vmatpush3.bf16.msra.mxu1 (!%p170_p3), %v883_v0  ;;  %v416_v3 = vsel (!%p170_p3), %vm414_vm0, %v885_v2, 0 }
   0x9   : > { %815 = vmatprep.subr.bf16.mxu0 (!%p170_p3), %v884_v1  ;;  %852 = vmatprep.subr.bf16.mxu1 (!%p170_p3), %v884_v1 }
   0xc   : > { %816 = vmatpush3.bf16.msra.mxu0 (!%p170_p3), %v884_v1  ;;  %855 = vmatpush3.bf16.msra.mxu1 (!%p170_p3), %v884_v1 }
   0xd   : > { %857 = vmatprep.subr.msk.bf16.mxu0 (!%p170_p3), %vm414_vm0, %v885_v2  ;;  %858 = vmatprep.subr.msk.bf16.mxu1 (!%p170_p3), %vm414_vm0, %v885_v2 }
   0xe   : > { %s1106_s20 = smov (!%p204_p4, %s752_s20), 63 }
   0xf   : > { %s753_s23 = sshll.u32 %s1106_s20, 2  ;;  %s755_s29 = sshll.u32 %s1106_s20, 3 }
  0x10   : > { %s979_s26 = scalar_lea.vmem %s1097_s0, %s753_s23  ;;  %818 = vmatpush3.bf16.msra.mxu0 %v416_v3  ;;  %856 = vmatpush3.bf16.msra.mxu1 %v416_v3  ;;  %s1024_s5 = scalar_lea.vmem %s1100_s3, %s755_s29 }
  0x11   : > { %v886_v4 = vld [vmem:[%s979_s26] sm:$0xff]   ;;  %v888_v6 = vld [vmem:[%s979_s26 + $0x8] sm:$0xff]   ;;  %v890_v8 = vld [vmem:[%s979_s26 + $0x10] sm:$0xff]  }
  0x12   : > { %v887_v5 = vld [vmem:[%s979_s26 + $0x40] sm:$0xff]   ;;  %819 = vmatprep.mubr.msk.bf16.mxu0 %vm365_vm1, %v886_v4  ;;  %v889_v7 = vld [vmem:[%s979_s26 + $0x48] sm:$0xff]   ;;  %v891_v9 = vld [vmem:[%s979_s26 + $0x50] sm:$0xff]  }
  0x13   : > { %835 = vmatprep.mubr.msk.bf16.mxu1 %vm365_vm1, %v887_v5  ;;  %820 = vmatmul.mubr.msk.bf16.vlgmr.msra.gmra.mrb[0].mxu0 %vm365_vm1, %v888_v6  ;;  %v892_v10 = vld [vmem:[%s979_s26 + $0x18] sm:$0xff]   ;;  %v894_v12 = vld [vmem:[%s979_s26 + $0x20] sm:$0xff]   ;;  %v896_v14 = vld [vmem:[%s979_s26 + $0x28] sm:$0xff]  }
  0x14   : > { %836 = vmatmul.mubr.msk.bf16.vlgmr.msra.gmra.mrb[0].mxu1 %vm365_vm1, %v889_v7  ;;  %823 = vmatprep.mubr.msk.bf16.mxu0 %vm365_vm1, %v890_v8  ;;  %v893_v11 = vld [vmem:[%s979_s26 + $0x58] sm:$0xff]   ;;  %v895_v13 = vld [vmem:[%s979_s26 + $0x60] sm:$0xff]   ;;  %v897_v15 = vld [vmem:[%s979_s26 + $0x68] sm:$0xff]  }
  0x15   : > { %839 = vmatprep.mubr.msk.bf16.mxu1 %vm365_vm1, %v891_v9  ;;  %v898_v16 = vld [vmem:[%s979_s26 + $0x30] sm:$0xff]   ;;  %v900_v18 = vld [vmem:[%s979_s26 + $0x38] sm:$0xff]  }
  0x16   : > { %v899_v17 = vld [vmem:[%s979_s26 + $0x70] sm:$0xff]   ;;  %v901_v19 = vld [vmem:[%s979_s26 + $0x78] sm:$0xff]  }
  0x1b   : > { %824 = vmatmul.mubr.msk.bf16.gmra.mrb[4].mxu0 %vm365_vm1, %v892_v10 }
  0x1c   : > { %840 = vmatmul.mubr.msk.bf16.gmra.mrb[4].mxu1 %vm365_vm1, %v893_v11  ;;  %827 = vmatprep.mubr.msk.bf16.mxu0 %vm365_vm1, %v894_v12 }
  0x1d   : > { %843 = vmatprep.mubr.msk.bf16.mxu1 %vm365_vm1, %v895_v13 }
  0x23   : > { %828 = vmatmul.mubr.msk.bf16.gmra.mrb[8].mxu0 %vm365_vm1, %v896_v14 }
  0x24   : > { %844 = vmatmul.mubr.msk.bf16.gmra.mrb[8].mxu1 %vm365_vm1, %v897_v15  ;;  %831 = vmatprep.mubr.msk.bf16.mxu0 %vm365_vm1, %v898_v16 }
  0x25   : > { %847 = vmatprep.mubr.msk.bf16.mxu1 %vm365_vm1, %v899_v17 }
  0x2b   : > { %832 = vmatmul.mubr.msk.bf16.gmra.mrb[12].mxu0 %vm365_vm1, %v900_v18 }
  0x2c   : > { %848 = vmatmul.mubr.msk.bf16.gmra.mrb[12].mxu1 %vm365_vm1, %v901_v19 }
  0xe6   : > { %v821_v21 = vpop.f32.mrb[0].mxu0 }
  0xe7   : > { %v837_v22 = vpop.f32.mrb[0].mxu1  ;;  %v461_v23 = vadd.f32 %v821_v21, %v1016_v20  ;;  %v452_v25 = vpop.f32.mrb[1].mxu0 }
  0xe8   : > { %v525_v24 = vadd.f32 %v837_v22, %v1016_v20  ;;  %v516_v26 = vpop.f32.mrb[1].mxu1  ;;  %v453_v27 = vadd.f32 %v1016_v20, %v452_v25  ;;  %v822_v29 = vpop.f32.mrb[2].mxu0 }
  0xe9   : > { %v517_v28 = vadd.f32 %v1016_v20, %v516_v26  ;;  %v838_v30 = vpop.f32.mrb[2].mxu1  ;;  %v581_v31 = vmax.f32 %v461_v23, 0.0  ;;  %v464_v33 = vadd.f32 %v822_v29, %v1016_v20  ;;  %v455_v35 = vpop.f32.mrb[3].mxu0 }
  0xea   : > { %v597_v32 = vmax.f32 %v525_v24, 0.0  ;;  %v528_v34 = vadd.f32 %v838_v30, %v1016_v20  ;;  %v519_v36 = vpop.f32.mrb[3].mxu1  ;;  %v579_v37 = vmax.f32 %v453_v27, 0.0  ;;  %v456_v39 = vadd.f32 %v1016_v20, %v455_v35 }
  0xeb   : > { %v595_v38 = vmax.f32 %v517_v28, 0.0  ;;  %v520_v40 = vadd.f32 %v1016_v20, %v519_v36  ;;  %613 = vst [vmem:[%s1024_s5 + $0x10] sm:$0xff] %v581_v31  ;;  %v582_v41 = vmax.f32 %v464_v33, 0.0 }
  0xec   : > { %629 = vst [vmem:[%s1024_s5 + $0x90] sm:$0xff] %v597_v32  ;;  %v598_v42 = vmax.f32 %v528_v34, 0.0  ;;  %611 = vst [vmem:[%s1024_s5] sm:$0xff] %v579_v37  ;;  %v580_v43 = vmax.f32 %v456_v39, 0.0 }
  0xed   : > { %627 = vst [vmem:[%s1024_s5 + $0x80] sm:$0xff] %v595_v38  ;;  %v596_v44 = vmax.f32 %v520_v40, 0.0  ;;  %614 = vst [vmem:[%s1024_s5 + $0x18] sm:$0xff] %v582_v41 }
  0xee   : > { %630 = vst [vmem:[%s1024_s5 + $0x98] sm:$0xff] %v598_v42  ;;  %612 = vst [vmem:[%s1024_s5 + $0x8] sm:$0xff] %v580_v43  ;;  %v825_v45 = vpop.f32.mrb[4].mxu0 }
  0xef   : > { %628 = vst [vmem:[%s1024_s5 + $0x88] sm:$0xff] %v596_v44  ;;  %v841_v46 = vpop.f32.mrb[4].mxu1  ;;  %v477_v47 = vadd.f32 %v825_v45, %v1016_v20  ;;  %v468_v49 = vpop.f32.mrb[5].mxu0 }
  0xf0   : > { %v541_v48 = vadd.f32 %v841_v46, %v1016_v20  ;;  %v532_v50 = vpop.f32.mrb[5].mxu1  ;;  %v469_v51 = vadd.f32 %v1016_v20, %v468_v49  ;;  %v826_v53 = vpop.f32.mrb[6].mxu0 }
  0xf1   : > { %v533_v52 = vadd.f32 %v1016_v20, %v532_v50  ;;  %v842_v54 = vpop.f32.mrb[6].mxu1  ;;  %v585_v55 = vmax.f32 %v477_v47, 0.0  ;;  %v480_v57 = vadd.f32 %v826_v53, %v1016_v20  ;;  %v471_v59 = vpop.f32.mrb[7].mxu0 }
  0xf2   : > { %v601_v56 = vmax.f32 %v541_v48, 0.0  ;;  %v544_v58 = vadd.f32 %v842_v54, %v1016_v20  ;;  %v535_v60 = vpop.f32.mrb[7].mxu1  ;;  %v583_v61 = vmax.f32 %v469_v51, 0.0  ;;  %v472_v63 = vadd.f32 %v1016_v20, %v471_v59 }
  0xf3   : > { %v599_v62 = vmax.f32 %v533_v52, 0.0  ;;  %v536_v0 = vadd.f32 %v1016_v20, %v535_v60  ;;  %617 = vst [vmem:[%s1024_s5 + $0x30] sm:$0xff] %v585_v55  ;;  %v586_v1 = vmax.f32 %v480_v57, 0.0 }
  0xf4   : > { %633 = vst [vmem:[%s1024_s5 + $0xb0] sm:$0xff] %v601_v56  ;;  %v602_v2 = vmax.f32 %v544_v58, 0.0  ;;  %615 = vst [vmem:[%s1024_s5 + $0x20] sm:$0xff] %v583_v61  ;;  %v584_v3 = vmax.f32 %v472_v63, 0.0 }
  0xf5   : > { %631 = vst [vmem:[%s1024_s5 + $0xa0] sm:$0xff] %v599_v62  ;;  %v600_v4 = vmax.f32 %v536_v0, 0.0  ;;  %618 = vst [vmem:[%s1024_s5 + $0x38] sm:$0xff] %v586_v1 }
  0xf6   : > { %634 = vst [vmem:[%s1024_s5 + $0xb8] sm:$0xff] %v602_v2  ;;  %616 = vst [vmem:[%s1024_s5 + $0x28] sm:$0xff] %v584_v3  ;;  %v829_v5 = vpop.f32.mrb[8].mxu0 }
  0xf7   : > { %632 = vst [vmem:[%s1024_s5 + $0xa8] sm:$0xff] %v600_v4  ;;  %v845_v6 = vpop.f32.mrb[8].mxu1  ;;  %v493_v7 = vadd.f32 %v829_v5, %v1016_v20  ;;  %v484_v9 = vpop.f32.mrb[9].mxu0 }
  0xf8   : > { %v557_v8 = vadd.f32 %v845_v6, %v1016_v20  ;;  %v548_v10 = vpop.f32.mrb[9].mxu1  ;;  %v485_v11 = vadd.f32 %v1016_v20, %v484_v9  ;;  %v830_v13 = vpop.f32.mrb[10].mxu0 }
  0xf9   : > { %v549_v12 = vadd.f32 %v1016_v20, %v548_v10  ;;  %v846_v14 = vpop.f32.mrb[10].mxu1  ;;  %v589_v15 = vmax.f32 %v493_v7, 0.0  ;;  %v496_v17 = vadd.f32 %v830_v13, %v1016_v20  ;;  %v487_v19 = vpop.f32.mrb[11].mxu0 }
  0xfa   : > { %v605_v16 = vmax.f32 %v557_v8, 0.0  ;;  %v560_v18 = vadd.f32 %v846_v14, %v1016_v20  ;;  %v551_v21 = vpop.f32.mrb[11].mxu1  ;;  %v587_v22 = vmax.f32 %v485_v11, 0.0  ;;  %v488_v24 = vadd.f32 %v1016_v20, %v487_v19 }
  0xfb   : > { %v603_v23 = vmax.f32 %v549_v12, 0.0  ;;  %v552_v25 = vadd.f32 %v1016_v20, %v551_v21  ;;  %621 = vst [vmem:[%s1024_s5 + $0x50] sm:$0xff] %v589_v15  ;;  %v590_v26 = vmax.f32 %v496_v17, 0.0 }
  0xfc   : > { %637 = vst [vmem:[%s1024_s5 + $0xd0] sm:$0xff] %v605_v16  ;;  %v606_v27 = vmax.f32 %v560_v18, 0.0  ;;  %619 = vst [vmem:[%s1024_s5 + $0x40] sm:$0xff] %v587_v22  ;;  %v588_v28 = vmax.f32 %v488_v24, 0.0 }
  0xfd   : > { %635 = vst [vmem:[%s1024_s5 + $0xc0] sm:$0xff] %v603_v23  ;;  %v604_v29 = vmax.f32 %v552_v25, 0.0  ;;  %622 = vst [vmem:[%s1024_s5 + $0x58] sm:$0xff] %v590_v26 }
  0xfe   : > { %638 = vst [vmem:[%s1024_s5 + $0xd8] sm:$0xff] %v606_v27  ;;  %620 = vst [vmem:[%s1024_s5 + $0x48] sm:$0xff] %v588_v28  ;;  %v833_v30 = vpop.f32.mrb[12].mxu0 }
  0xff   : > { %636 = vst [vmem:[%s1024_s5 + $0xc8] sm:$0xff] %v604_v29  ;;  %v849_v31 = vpop.f32.mrb[12].mxu1  ;;  %v509_v32 = vadd.f32 %v833_v30, %v1016_v20  ;;  %v500_v34 = vpop.f32.mrb[13].mxu0 }
 0x100   : > { %v573_v33 = vadd.f32 %v849_v31, %v1016_v20  ;;  %v564_v35 = vpop.f32.mrb[13].mxu1  ;;  %v501_v36 = vadd.f32 %v1016_v20, %v500_v34  ;;  %v834_v38 = vpop.f32.mrb[14].mxu0 }
 0x101   : > { %v565_v37 = vadd.f32 %v1016_v20, %v564_v35  ;;  %v850_v39 = vpop.f32.mrb[14].mxu1  ;;  %v593_v40 = vmax.f32 %v509_v32, 0.0  ;;  %v512_v42 = vadd.f32 %v834_v38, %v1016_v20  ;;  %v503_v44 = vpop.f32.mrb[15].mxu0 }
 0x102   : > { %v609_v41 = vmax.f32 %v573_v33, 0.0  ;;  %v576_v43 = vadd.f32 %v850_v39, %v1016_v20  ;;  %v567_v45 = vpop.f32.mrb[15].mxu1  ;;  %v591_v46 = vmax.f32 %v501_v36, 0.0  ;;  %v504_v48 = vadd.f32 %v1016_v20, %v503_v44 }
 0x103   : > { %v607_v47 = vmax.f32 %v565_v37, 0.0  ;;  %v568_v49 = vadd.f32 %v1016_v20, %v567_v45  ;;  %625 = vst [vmem:[%s1024_s5 + $0x70] sm:$0xff] %v593_v40  ;;  %v594_v50 = vmax.f32 %v512_v42, 0.0 }
 0x104   : > { %641 = vst [vmem:[%s1024_s5 + $0xf0] sm:$0xff] %v609_v41  ;;  %v610_v51 = vmax.f32 %v576_v43, 0.0  ;;  %623 = vst [vmem:[%s1024_s5 + $0x60] sm:$0xff] %v591_v46  ;;  %v592_v52 = vmax.f32 %v504_v48, 0.0 }
 0x105   : > { %639 = vst [vmem:[%s1024_s5 + $0xe0] sm:$0xff] %v607_v47  ;;  %v608_v53 = vmax.f32 %v568_v49, 0.0  ;;  %626 = vst [vmem:[%s1024_s5 + $0x78] sm:$0xff] %v594_v50 }
 0x106   : > { %642 = vst [vmem:[%s1024_s5 + $0xf8] sm:$0xff] %v610_v51  ;;  %624 = vst [vmem:[%s1024_s5 + $0x68] sm:$0xff] %v592_v52 }
 0x107   : > { %640 = vst [vmem:[%s1024_s5 + $0xe8] sm:$0xff] %v608_v53 }
 0x108 PF: > { %s13_s14 = sadd.s32 1, %s924_s14   ;;  %s1101_s12 = smov %s920_s13 }
 0x109   : > { %p10_p5 = scmp.ge.s32.totalorder %s13_s14, 4   ;;  %s1102_s13 = smov %s1104_s15 }
 0x10b   :  { %12 = sbr.rel (!%p10_p5) target bundleno = 2 (0x2), region = 68 }

</bundles_post_ra>
